<compile_context>
chip_gen: v7x
topology: tpu7x:2x2x1
jax: 0.10.0
libtpu: 0.0.40
codegen_flags: <defaults>
</compile_context>

<pallas_src>
import jax
import jax.numpy as jnp
from jax.experimental import pallas as pl
from jax.experimental.pallas import tpu as pltpu


def rnet_kernel(x_ref, w1_ref, w2_ref, o_ref):
    # x_ref:  (C_in, TM)      spatial on lanes, channels on sublanes
    # w1_ref: (hid_c, C_in)   w2_ref: (C_out, hid_c)   o_ref: (C_out, TM)
    # TODO(synk): on v7x, if a bundle dump shows the MXU push cadence binding
    # (K=C_in/hid_c wastes the 256-deep contraction), swap these tiny-K GEMMs
    # for VPU scalar-weight FMAs or a kron(I_k, w) block-diagonal packed weight.
    h = jnp.dot(w1_ref[...], x_ref[...], preferred_element_type=jnp.float32)
    h = jnp.maximum(h, 0.25 * h)          # LeakyReLU(negative_slope=0.25)
    y = jnp.dot(w2_ref[...], h, preferred_element_type=jnp.float32)
    o_ref[...] = y.astype(o_ref.dtype)


def rnet_forward(x_ncdhw, w1, w2, *, tm=32768, min_grid_blocks=4):
    """x_ncdhw: [N, C_in, D, H, W]; w1: [hid_c, C_in, 1,1,1]; w2: [C_out, hid_c, 1,1,1]."""
    N, C_in, D, H, W = x_ncdhw.shape
    hid_c = w1.shape[0]
    C_out = w2.shape[0]
    S = D * H * W

    # Free reshapes (memory layout already N-major, C second): no transposes.
    x3 = x_ncdhw.reshape(N, C_in, S)
    w1_m = w1.reshape(hid_c, C_in)      # [hid_c, C_in]   (used untransposed)
    w2_m = w2.reshape(C_out, hid_c)     # [C_out, hid_c]

    # Lane-dense tile: multiple of 128, capped at the 128-padded spatial size.
    tm = max(128, (tm // 128) * 128)
    tm = min(tm, pl.cdiv(S, 128) * 128)
    # Keep >= min_grid_blocks total grid blocks (megacore on v7x needs >=2
    # parallel blocks; >=4 also leaves steps for DMA/compute overlap), as long
    # as S allows tiles >= 128.
    while tm > 128 and N * pl.cdiv(S, tm) < min_grid_blocks:
        tm = max(128, ((tm // 2) // 128) * 128)
    num_s_blocks = pl.cdiv(S, tm)

    itemsize = x3.dtype.itemsize
    cost = pl.CostEstimate(
        flops=2 * N * S * (C_in * hid_c + hid_c * C_out),
        transcendentals=0,
        bytes_accessed=(x3.size + N * C_out * S + w1_m.size + w2_m.size) * itemsize,
    )

    out3 = pl.pallas_call(
        rnet_kernel,
        out_shape=jax.ShapeDtypeStruct((N, C_out, S), x3.dtype),
        grid_spec=pltpu.PrefetchScalarGridSpec(
            num_scalar_prefetch=0,
            grid=(N, num_s_blocks),
            in_specs=[
                # batch dim squeezed out; kernel sees (C_in, tm); last block masked
                pl.BlockSpec((None, C_in, tm), lambda n, j: (n, 0, j)),
                # weights stay VMEM-resident (constant index_map, full blocks)
                pl.BlockSpec((hid_c, C_in), lambda n, j: (0, 0)),
                pl.BlockSpec((C_out, hid_c), lambda n, j: (0, 0)),
            ],
            out_specs=pl.BlockSpec((None, C_out, tm), lambda n, j: (n, 0, j)),
        ),
        compiler_params=pltpu.CompilerParams(
            dimension_semantics=("parallel", "parallel")),
        cost_estimate=cost,
    )(x3, w1_m, w2_m)

    # Free reshape back to NCDHW (no tail slicing needed).
    return out3.reshape(N, C_out, D, H, W)


def rnet_reference(x_ncdhw, w1, w2):
    """Pure-JAX reference of the PyTorch forward (1x1x1 convs as matmuls)."""
    N, C_in, D, H, W = x_ncdhw.shape
    hid_c, C_out = w1.shape[0], w2.shape[0]
    xf = jnp.transpose(x_ncdhw, (0, 2, 3, 4, 1)).reshape(-1, C_in)
    h = xf @ w1.reshape(hid_c, C_in).T
    h = jnp.where(h >= 0, h, 0.25 * h)
    y = h @ w2.reshape(C_out, hid_c).T
    return jnp.transpose(y.reshape(N, D, H, W, C_out), (0, 4, 1, 2, 3))


if __name__ == "__main__":
    # Module hyperparameters (small, consistent with forward semantics).
    in_c, out_c = 8, 8
    hid_c = in_c // 2
    # Spatial size chosen so S = D*H*W = 300 is NOT a multiple of 128:
    # exercises the pl.cdiv grid + masked partial-tail-block path.
    N, D, H, W = 2, 3, 10, 10

    key = jax.random.PRNGKey(0)
    kx, k1, k2 = jax.random.split(key, 3)

    # Deterministic synthetic parameters (Conv3d weight shape: [out, in, 1,1,1]).
    # The PyTorch init loop only touches Conv2d/Linear, so Conv3d keeps default
    # init; here we just use deterministic scaled normals.  dropout_r is unused
    # in the forward pass.
    x = jax.random.normal(kx, (N, in_c, D, H, W), dtype=jnp.float32)
    w1 = jax.random.normal(k1, (hid_c, in_c, 1, 1, 1), dtype=jnp.float32) * (1.0 / jnp.sqrt(in_c))
    w2 = jax.random.normal(k2, (out_c, hid_c, 1, 1, 1), dtype=jnp.float32) * (1.0 / jnp.sqrt(hid_c))

    # Production defaults (tm=32768); the min-grid-blocks cap shrinks the tile
    # automatically for this tiny test shape while still exercising multiple
    # grid blocks and a masked partial tail block.
    out = rnet_forward(x, w1, w2)
    out = jax.block_until_ready(out)

    ref = rnet_reference(x, w1, w2)
    assert out.shape == (N, out_c, D, H, W)
    assert jnp.allclose(out, ref, atol=1e-5, rtol=1e-5)

    print("KERNEL_OK")
</pallas_src>

<mosaic_0001>
module attributes {stable_mosaic.version = 11 : i64} {
  func.func @rnet_kernel(%arg0: i32, %arg1: i32, %arg2: memref<1x8x128xf32, #tpu.memory_space<vmem>>, %arg3: memref<4x8xf32, #tpu.memory_space<vmem>>, %arg4: memref<8x4xf32, #tpu.memory_space<vmem>>, %arg5: memref<1x8x128xf32, #tpu.memory_space<vmem>>) attributes {dimension_semantics = [#tpu.dimension_semantics<parallel>, #tpu.dimension_semantics<parallel>], iteration_bounds = array<i64: 2, 3>, scalar_prefetch = 0 : i64, scratch_operands = 0 : i64, tpu.core_type = #tpu.core_type<tc>, window_params = [{transform_indices = @transform_0, window_bounds = array<i64: 1, 8, 128>}, {pipeline_mode = #tpu.pipeline_mode<synchronous>, transform_indices = @transform_1, window_bounds = array<i64: 4, 8>}, {pipeline_mode = #tpu.pipeline_mode<synchronous>, transform_indices = @transform_2, window_bounds = array<i64: 8, 4>}, {transform_indices = @transform_3, window_bounds = array<i64: 1, 8, 128>}]} {
    %c0 = arith.constant 0 : index
    %c0_0 = arith.constant 0 : index
    %0 = vector.load %arg3[%c0, %c0_0] : memref<4x8xf32, #tpu.memory_space<vmem>>, vector<4x8xf32>
    %c0_1 = arith.constant 0 : index
    %c0_2 = arith.constant 0 : index
    %c0_3 = arith.constant 0 : index
    %1 = vector.load %arg2[%c0_1, %c0_2, %c0_3] : memref<1x8x128xf32, #tpu.memory_space<vmem>>, vector<1x8x128xf32>
    %2 = vector.shape_cast %1 : vector<1x8x128xf32> to vector<8x128xf32>
    %cst = arith.constant dense<0.000000e+00> : vector<4x128xf32>
    %3 = tpu.matmul %0, %2, %cst {dimension_numbers = #tpu.dot_dimension_numbers<[1], [0], [0], [1], [0, 0, 1, 1], [], []>} : vector<4x8xf32>, vector<8x128xf32>, vector<4x128xf32> -> vector<4x128xf32>
    %cst_4 = arith.constant 2.500000e-01 : f32
    %4 = vector.broadcast %cst_4 : f32 to vector<4x128xf32>
    %5 = arith.mulf %4, %3 : vector<4x128xf32>
    %6 = arith.maximumf %3, %5 : vector<4x128xf32>
    %c0_5 = arith.constant 0 : index
    %c0_6 = arith.constant 0 : index
    %7 = vector.load %arg4[%c0_5, %c0_6] : memref<8x4xf32, #tpu.memory_space<vmem>>, vector<8x4xf32>
    %cst_7 = arith.constant dense<0.000000e+00> : vector<8x128xf32>
    %8 = tpu.matmul %7, %6, %cst_7 {dimension_numbers = #tpu.dot_dimension_numbers<[1], [0], [0], [1], [0, 0, 1, 1], [], []>} : vector<8x4xf32>, vector<4x128xf32>, vector<8x128xf32> -> vector<8x128xf32>
    %c0_8 = arith.constant 0 : index
    %c0_9 = arith.constant 0 : index
    %c0_10 = arith.constant 0 : index
    %9 = vector.load %arg5[%c0_8, %c0_9, %c0_10] : memref<1x8x128xf32, #tpu.memory_space<vmem>>, vector<1x8x128xf32>
    %10 = vector.shape_cast %9 : vector<1x8x128xf32> to vector<8x128xf32>
    %11 = vector.shape_cast %8 : vector<8x128xf32> to vector<1x8x128xf32>
    tpu.vector_store %arg5[%c0_8, %c0_9, %c0_10], %11 {strides = array<i32>} : memref<1x8x128xf32, #tpu.memory_space<vmem>>, vector<1x8x128xf32>,
    return
  }
  func.func @transform_0(%arg0: i32, %arg1: i32) -> (i32, i32, i32) {
    %c0_i32 = arith.constant 0 : i32
    %c0_i32_0 = arith.constant 0 : i32
    return %arg0, %c0_i32, %arg1 : i32, i32, i32
  }
  func.func @transform_1(%arg0: i32, %arg1: i32) -> (i32, i32) {
    %c0_i32 = arith.constant 0 : i32
    %c0_i32_0 = arith.constant 0 : i32
    %c0_i32_1 = arith.constant 0 : i32
    return %c0_i32, %c0_i32_0 : i32, i32
  }
  func.func @transform_2(%arg0: i32, %arg1: i32) -> (i32, i32) {
    %c0_i32 = arith.constant 0 : i32
    %c0_i32_0 = arith.constant 0 : i32
    %c0_i32_1 = arith.constant 0 : i32
    return %c0_i32, %c0_i32_0 : i32, i32
  }
  func.func @transform_3(%arg0: i32, %arg1: i32) -> (i32, i32, i32) {
    %c0_i32 = arith.constant 0 : i32
    %c0_i32_0 = arith.constant 0 : i32
    return %arg0, %c0_i32, %arg1 : i32, i32, i32
  }
}

</mosaic_0001>

<bundles_post_ra>
// kernel: tpu_custom_call.1
= control target key start
LH: loop header
LB: loop body
LE: loop exit
PB: predicated region body
PF: predicated region fallthrough
CT: control target
= control target key end

     0   :  { %8 = vsyncpa [#allocation3], 0  ;;  %s927_s0 = inlined_call_operand.hbm [shape: f32[2,8,300], index: 0, kind: input, shape index: {}]   ;;  %s928_s1 = inlined_call_operand.vmem [shape: f32[4,8], index: 1, kind: input, shape index: {}]   ;;  %s929_s2 = inlined_call_operand.vmem [shape: f32[8,4], index: 2, kind: input, shape index: {}]   ;;  %s930_s3 = inlined_call_operand.hbm [shape: f32[2,8,300], index: 3, kind: output, shape index: {}]  }
   0x1   :  { %10 = vsyncpa [#allocation3 + $0x1], 0 }
   0x2   :  { %11 = vsyncpa [#allocation4], 0 }
   0x3   :  { %13 = vsyncpa [#allocation4 + $0x1], 0  ;;  %s729_s12 = smov 0   ;;  %s731_s13 = smov 0  }
   0x4   :  { %s733_s14 = smov 0   ;;  %s735_s15 = smov 0  }
   0x5   :  { %s737_s16 = smov 0   ;;  %s739_s17 = smov 0  }
   0x6   :  { %s741_s18 = smov 0   ;;  %s743_s19 = smov 0  }
   0x7 LB: > { %s463_s20 = sadd.s32 4294967295, %s703_s19   ;;  %s464_s21 = sadd.s32 4294967294, %s703_s19   ;;  %s703_s19 = sphi %s743_s19, %s19_s19   ;;  %s699_s18 = sphi %s741_s18, %s946_s18   ;;  %s695_s17 = sphi %s739_s17, %s945_s17   ;;  %s691_s16 = sphi %s737_s16, %s944_s16   ;;  %s687_s15 = sphi %s735_s15, %s943_s15   ;;  %s683_s14 = sphi %s733_s14, %s942_s14   ;;  %s679_s13 = sphi %s731_s13, %s941_s13   ;;  %s675_s12 = sphi %s729_s12, %s940_s12  }
   0x8   : > { %s28_s22 = sadd.s32 1, %s695_s17  ;;  %s31_s23 = sadd.s32 1, %s699_s18 }
   0x9   : > { %p29_p0 = scmp.ge.s32.totalorder %s28_s22, 3  ;;  %s40_s24 = sadd.s32 1, %s683_s14 }
   0xa   : > { %p47_p1 = scmp.ne.s32.totalorder %s683_s14, %s679_s13  ;;  %p48_p2 = scmp.eq.s32.totalorder %s703_s19, 0 }
   0xb   : > { %s948_s22 = smov (%p29_p0, %s28_s22), 0  ;;  %s950_s23 = smov (!%p29_p0, %s31_s23), %s699_s18 }
   0xc   : > { %s36_s25 = ssub.s32 %s695_s17, %s948_s22  ;;  %p782_p3 = por %p48_p2, %p47_p1 }
   0xd   : > { %p33_p4 = scmp.ge.s32.totalorder %s950_s23, 2  ;;  %p53_p5 = scmp.ne.s32.totalorder %s679_s13, %s675_s12 }
   0xe   : > { %p54_p6 = scmp.eq.s32.totalorder %s463_s20, 0  ;;  %p121_p7 = scmp.eq.s32.totalorder %s463_s20, 5 }
   0xf   : > { %s952_s23 = smov (%p33_p4, %s950_s23), 0  ;;  %p127_p10 = scmp.eq.s32.totalorder %s464_s21, 5 }
  0x10   : > { %p790_p8 = por %p54_p6, %p53_p5  ;;  %p794_p9 = por %p121_p7, %p47_p1 }
  0x11   : > { %s35_s29 = ssub.s32 %s699_s18, %s952_s23  ;;  %p800_p12 = por %p127_p10, %p53_p5 }
  0x12   : > { %s934_s28 = scalar_select %p794_p9, 1, 0 }
  0x13   : > { %s37_s30 = sor.u32 %s36_s25, %s35_s29  ;;  %p507_p13 = scmp.lt.s32.totalorder %s703_s19, 6 }
  0x14   : > { %p38_p11 = scmp.eq.s32.totalorder %s37_s30, 0  ;;  %s153_s5 = sand.u32 1, %s683_s14  }
  0x15   : > { %s935_s4 = scalar_select %p800_p12, 1, 0 }
  0x16   : > { %s807_s6 = scalar_select %p38_p11, %s683_s14, %s40_s24  }
  0x17   : > { %s467_s7 = sshll.u32 %s153_s5, 3  ;;  %s493_s8 = smul.u32 3, %s699_s18 }
  0x18   : > { %s157_s9 = scalar_lea.vmem [#allocation2], %s467_s7  ;;  %p812_p0 = pnand %p507_p13, %p782_p3 }
  0x19   : > { %s166_s10 = sshll.u32 %s157_s9, 4  ;;  %s162_s20 = sadd.s32 %s695_s17, %s493_s8  ;;  %s817_s10 = int_to_ptr.vmem [resolvable:$true] %s166_s10 }
  0x1a   : > { %s468_s21 = sshll.u32 %s162_s20, 7  ;;  %s154_s26 = scalar_lea.sflag [#allocation3], %s153_s5 }
  0x1b   : > { %s822_s24 = scalar_lea.hbm %s927_s0, %s468_s21  ;;  %p577_p3 = pneg %p812_p0 }
  0x1c   : > { %s575_s30 = scalar_lea.hbm %s822_s24, 128  ;;  %s580_s9 = scalar_lea.hbm %s927_s0, 768 }
  0x1d   : > { %p576_p2 = scmp.ne.s32.totalorder %s822_s24, %s575_s30  ;;  %p581_p6 = scmp.lt.u32.totalorder %s822_s24, %s927_s0 }
  0x1e   : > { %p582_p7 = scmp.lt.u32.totalorder %s580_s9, %s575_s30  ;;  %p584_p11 = scmp.lt.u32.totalorder %s575_s30, %s822_s24 }
  0x1f   : > { %p578_p4 = pnand %p577_p3, %p576_p2 }
  0x20   : > { %p583_p10 = por %p582_p7, %p581_p6 }
  0x21   : > { %p579_p5 = pneg %p578_p4 }
  0x22   : > { %p585_p13 = por %p584_p11, %p583_p10 }
  0x24   : > { %p586_p1 = pnand %p585_p13, %p579_p5 }
  0x26   : > { %589 = shalt.err (!%p586_p1)
}
  0x27   : > { %s590_s5 = scalar_lea.vmem %s817_s10, 128  ;;  %s705_s25 = smov [#allocation2]  }
  0x28   : > { %p591_p2 = scmp.ne.s32.totalorder %s817_s10, %s590_s5  ;;  %s595_s29 = sshll.u32 %s705_s25, 4  ;;  %s596_s29 = int_to_ptr.vmem [resolvable:$false] %s595_s29 }
  0x29   : > { %s597_s7 = scalar_lea.vmem %s596_s29, 256  ;;  %p598_p9 = scmp.lt.s32.totalorder %s817_s10, %s596_s29 }
  0x2a   : > { %p593_p4 = pnand %p591_p2, %p577_p3  ;;  %p599_p6 = scmp.lt.s32.totalorder %s597_s7, %s590_s5 }
  0x2c   : > { %p594_p12 = pneg %p593_p4  ;;  %p600_p7 = por %p599_p6, %p598_p9 }
  0x2e   : > { %p601_p10 = pnand %p600_p7, %p594_p12 }
  0x30   : > { %604 = shalt.err (!%p601_p10)
}
  0x31   : > { %502 = dma.hbm_to_vmem [thread:$0]  (!%p812_p0), %s822_s24, 128, %s817_s10, %s154_s26  }
  0x32   : > { %p171_p1 = scmp.lt.s32.totalorder %s703_s19, 7  ;;  %p937_p5 = scmp.ge.s32.totalorder %s703_s19, 1 }
  0x34   : > { %p172_p3 = pnand %p937_p5, %p171_p1 }
  0x35   : > { %s854_s30 = sand.u32 (!%p172_p3), 1, %s679_s13  }
  0x36   : > { %175 = sbr.rel (%p172_p3) target bundleno = 509 (0x1fd), region = 32  ;;  %s470_s8 = sshll.u32 (!%p172_p3), %s854_s30, 3 }
  0x37   : > { %s178_s9 = scalar_lea.sflag (!%p172_p3), [#allocation3], %s854_s30  ;;  %s181_s20 = scalar_lea.vmem (!%p172_p3), [#allocation2], %s470_s8 }
  0x3d   : > { %666 = dma.done.wait (%p790_p8), %s178_s9, 128  }
  0x3e   : > { %668 = vsyncadd (%p790_p8), %s178_s9, 4294967168  ;;  %v706_v0 = vmov 0.0   ;;  %vm707_vm0 = vmmov 0   ;;  %vm206_vm1 = vcmask 64512   ;;  %v205_v1 = vld [vmem:[%s181_s20] sm:$0xff]  ;;  %vm287_vm2 = vcmask 1043456  }
  0x3f   : > { %483 = vmatprep.subr.mxu0 %v706_v0  ;;  %485 = vmatprep.mubr.msk.f32.mxu0 %vm707_vm0, %v706_v0  ;;  %v204_v2 = vld [vmem:[%s928_s1] sm:$0xf]  ;;  %vm283_vm3 = vcmask 31744   ;;  %s494_s26 = smul.u32 3, %s691_s16  ;;  %s203_s5 = scalar_lea.vmem [#allocation5], %s470_s8 }
  0x40   : > { %488 = vmatprep.subr.mxu1 %v706_v0  ;;  %490 = vmatprep.mubr.msk.f32.mxu1 %vm707_vm0, %v706_v0  ;;  %v282_v7 = vld [vmem:[%s929_s2] sm:$0xff]  ;;  %s378_s25 = sshll.u32 %s203_s5, 4  ;;  %s363_s10 = scalar_lea.sflag [#allocation4], %s854_s30  ;;  %s870_s25 = int_to_ptr.vmem [resolvable:$true] %s378_s25 }
  0x41   : > { %484 = vmatpush3.msra.mxu0 %v205_v1  ;;  %s374_s21 = sadd.s32 %s687_s15, %s494_s26  ;;  %s605_s11 = scalar_lea.vmem %s870_s25, 128 }
  0x42   : > { %486 = vmatmul.mubr.msk.f32.vlgmr.msra.gmra.mrb[0].mxu0 %vm206_vm1, %v204_v2  ;;  %s476_s29 = sshll.u32 %s374_s21, 7  ;;  %p606_p8 = scmp.ne.s32.totalorder %s870_s25, %s605_s11 }
  0x43   : > { %s875_s20 = scalar_lea.hbm %s930_s3, %s476_s29  ;;  %p938_p9 = scmp.ne.s32.totalorder %s934_s28, 0 }
  0x44   : > { %s708_s15 = smov [#allocation5]  }
  0x45   : > { %p607_p12 = pnand %p606_p8, %p938_p9  ;;  %s609_s16 = sshll.u32 %s708_s15, 4  ;;  %s610_s16 = int_to_ptr.vmem [resolvable:$false] %s609_s16 }
  0x46   : > { %s611_s8 = scalar_lea.vmem %s610_s16, 256  ;;  %p612_p11 = scmp.lt.s32.totalorder %s870_s25, %s610_s16 }
  0x47   : > { %p608_p0 = pneg %p607_p12  ;;  %p613_p13 = scmp.lt.s32.totalorder %s611_s8, %s605_s11 }
  0x49   : > { %p614_p2 = por %p613_p13, %p612_p11 }
  0x4b   : > { %p615_p4 = pnand %p614_p2, %p608_p0 }
 0x115   : > { %v276_v3 = vpop.f32.mrb[0].mxu0 }
 0x116   : > { %v280_v4 = vmul.f32 0.25, %v276_v3  ;;  %v487_v5 = vpop.f32.mrb[1].mxu0 }
 0x118   : > { %v281_v6 = vmax.f32 %v276_v3, %v280_v4 }
 0x11a   : > { %489 = vmatpush3.msk.msra.mxu1 %vm287_vm2, %v281_v6 }
 0x11b   : > { %491 = vmatmul.mubr.msk.f32.vlgmr.msra.gmra.mrb[0].mxu1 %vm283_vm3, %v282_v7 }
 0x1ee   : > { %v357_v8 = vpop.f32.mrb[0].mxu1 }
 0x1ef   : > { %361 = vst [vmem:[%s203_s5] sm:$0xff] %v357_v8  ;;  %v492_v9 = vpop.f32.mrb[1].mxu1 }
 0x1f0   : > { %618 = shalt.err (!%p615_p4)
}
 0x1f1   : > { %s619_s30 = scalar_lea.hbm %s875_s20, 128  ;;  %s623_s26 = scalar_lea.hbm %s930_s3, 768 }
 0x1f2   : > { %p620_p6 = scmp.ne.s32.totalorder %s875_s20, %s619_s30  ;;  %p624_p1 = scmp.lt.u32.totalorder %s875_s20, %s930_s3 }
 0x1f3   : > { %p625_p5 = scmp.lt.u32.totalorder %s623_s26, %s619_s30  ;;  %p627_p8 = scmp.lt.u32.totalorder %s619_s30, %s875_s20 }
 0x1f4   : > { %p621_p7 = pnand %p620_p6, %p938_p9 }
 0x1f5   : > { %p626_p3 = por %p625_p5, %p624_p1 }
 0x1f6   : > { %p622_p10 = pneg %p621_p7 }
 0x1f7   : > { %p628_p12 = por %p627_p8, %p626_p3 }
 0x1f9   : > { %p629_p0 = pnand %p628_p12, %p622_p10 }
 0x1fb   : > { %632 = shalt.err (!%p629_p0)
}
 0x1fc   : > { %497 = dma.vmem_to_hbm [thread:$0]  (%p938_p9), %s870_s25, 128, %s875_s20, %s363_s10  }
 0x1fd PF: > { %p508_p11 = scmp.ge.s32.totalorder %s703_s19, 2  ;;  %s390_s29 = sand.u32 1, %s675_s12  }
 0x1fe   : > { %p939_p13 = scmp.ne.s32.totalorder %s935_s4, 0  ;;  %s391_s7 = scalar_lea.sflag [#allocation4], %s390_s29 }
 0x200   : > { %p504_p2 = pnand %p508_p11, %p939_p13 }
 0x202   : > { %670 = dma.done.wait (!%p504_p2), %s391_s7, 128  }
 0x203   : > { %672 = vsyncadd (!%p504_p2), %s391_s7, 4294967168  ;;  %s19_s19 = sadd.s32 1, %s703_s19   ;;  %s940_s12 = smov %s679_s13 }
 0x204   : > { %p16_p4 = scmp.ge.s32.totalorder %s19_s19, 8   ;;  %s941_s13 = smov %s683_s14 }
 0x205   : > { %s942_s14 = smov %s807_s6  ;;  %s943_s15 = smov %s695_s17 }
 0x206   : > { %s944_s16 = smov %s699_s18  ;;  %s945_s17 = smov %s948_s22 }
 0x207   : > { %s946_s18 = smov %s952_s23  ;;  %18 = sbr.rel (!%p16_p4) target bundleno = 7 (0x7), region = 77 }
 0x20e   :  { %396 = vsyncpa [#allocation3], 1 }
 0x20f   :  { %398 = vsyncpa [#allocation3 + $0x1], 1 }
 0x210   :  { %399 = vsyncpa [#allocation4], 1 }
 0x211   :  { %401 = vsyncpa [#allocation4 + $0x1], 1 }

</bundles_post_ra>
